<compile_context>
chip_gen: v5e
topology: v5e:2x2
jax: 0.10.0
libtpu: 0.0.40
codegen_flags: <defaults>
</compile_context>

<pallas_src>
import functools

import jax
import jax.numpy as jnp
from jax.experimental import pallas as pl
from jax.experimental.pallas import tpu as pltpu


def _attention_kernel(n_heads, x_ref, wqkv_ref, bqkv_ref, wp_ref, bp_ref,
                      o_ref, qkv_sc, attn_sc):
    bt, t, d = x_ref.shape                 # batch tile, tokens, model dim
    h = n_heads
    hd = d // h
    m = bt * t

    # ---- 1) Fused QKV projection for the whole batch tile: (m, d) @ (d, 3d).
    # Softmax scale is already folded into the q columns/bias on the host.
    x2d = x_ref[...].reshape(m, d)                               # bf16, leading-dim merge
    qkv = jnp.dot(x2d, wqkv_ref[...],
                  preferred_element_type=jnp.float32) + bqkv_ref[...]   # (m, 3d) f32
    qkv_sc[...] = qkv.astype(jnp.bfloat16)                       # cast once; f32 copy dies

    # ---- 2) Per-sample attention.  fori-style loop bounds live ranges; heads
    # stay batched on the MXU inside each iteration.
    @pl.loop(0, bt)
    def _(b):
        row0 = b * t
        if t % 8 == 0:                                           # static hint (trace time)
            row0 = pl.multiple_of(row0, 8)

        q = qkv_sc[pl.ds(row0, t), 0 * d:1 * d]                  # (t, d) bf16, scale folded
        k = qkv_sc[pl.ds(row0, t), 1 * d:2 * d]
        v = qkv_sc[pl.ds(row0, t), 2 * d:3 * d]

        # Split heads (lane slices -> leading head axis) so the attention
        # matmuls run as one batched MXU op per site.
        qh = jnp.stack([q[:, i * hd:(i + 1) * hd] for i in range(h)])   # (h, t, hd)
        kh = jnp.stack([k[:, i * hd:(i + 1) * hd] for i in range(h)])
        vh = jnp.stack([v[:, i * hd:(i + 1) * hd] for i in range(h)])

        # Scores: contract head_dim of K in its stored layout (no materialized .T).
        s = jnp.einsum("hqc,hkc->hqk", qh, kh,
                       preferred_element_type=jnp.float32)              # (h, t, t) f32
        s = s - jnp.max(s, axis=-1, keepdims=True)                      # f32 softmax math
        p = jnp.exp(s)
        p = p * pl.reciprocal(jnp.sum(p, axis=-1, keepdims=True), approx=True)

        o_h = jnp.einsum("hqk,hkc->hqc", p.astype(jnp.bfloat16), vh,
                         preferred_element_type=jnp.float32)            # (h, t, hd) f32

        # Concatenate heads back along lanes into the tile-wide scratch; the
        # output projection (and its head reduction) happens once, after the loop.
        attn_sc[pl.ds(row0, t), :] = jnp.concatenate(
            [o_h[i] for i in range(h)], axis=-1).astype(jnp.bfloat16)   # (t, d)

    # ---- 3) Output projection for the whole tile: head reduction is the MXU K
    # contraction of one (m, d) @ (d, d) matmul.
    out = jnp.dot(attn_sc[...], wp_ref[...],
                  preferred_element_type=jnp.float32) + bp_ref[...]     # (m, d) f32
    o_ref[...] = out.reshape(bt, t, d).astype(o_ref.dtype)


def _device_kind():
    try:
        return jax.devices()[0].device_kind.lower()
    except Exception:
        return ""


def _min_grid_steps():
    """v7x has 2 TensorCores: require >=4 grid steps so each core still software
    pipelines.  v5e/v6e have one TC: don't fragment the work."""
    kind = _device_kind()
    return 4 if ("v7" in kind or "7x" in kind) else 1


def _vmem_cap_bytes():
    """3/4 of physical VMEM (leaves compiler-scratch headroom): ~48 MiB on v7x,
    ~96 MiB on v5e/v6e."""
    try:
        cap = pltpu.get_tpu_info().vmem_capacity_bytes
    except Exception:
        kind = _device_kind()
        cap = (64 if ("v7" in kind or "7x" in kind) else 128) * 2 ** 20
    return int(cap) * 3 // 4


def _pick_batch_tile(n, t, min_grid):
    """Grow the batch tile toward m = bt*t ~ 512 rows (keeps the MXU M streaming
    full), subject to a minimum grid extent (v7x only) and bt | n."""
    bt = max(1, min(n, 512 // max(t, 1)))
    while bt > 1 and n // bt < min_grid:
        bt -= 1
    while n % bt:
        bt -= 1
    return bt


def _vmem_limit_bytes(bt, t, d, h, hd, out_bytes, single_buffered_weights):
    m = bt * t
    wbuf = 1 if single_buffered_weights else 2
    io = 2 * m * d * 2 + 2 * m * d * out_bytes            # x(bf16)+out blocks, double-buffered
    w = wbuf * 2 * (3 * d * d + d * d) + wbuf * 4 * 4 * d  # bf16 weights + f32 biases
    scratch = m * 3 * d * 2 + m * d * 2                   # qkv_sc + attn_sc (bf16)
    live = (m * 3 * d * 4                                 # f32 qkv before the bf16 store
            + 3 * t * d * 2                               # per-sample stacked q/k/v (bf16)
            + 2 * h * t * t * 4                           # scores + probs (f32)
            + h * t * hd * 4 + t * d * 4                  # per-sample head outputs + concat
            + m * d * 4)                                  # f32 projection output
    need = io + w + scratch + live
    return int(min(_vmem_cap_bytes(), max(16 * 2 ** 20, int(need * 1.5))))


def attention_pallas(x, w_qkv, b_qkv, w_proj, b_proj, *, n_heads,
                     batch_tile=None, out_dtype=None):
    """x: (N, T, D); w_qkv: (D, 3D); b_qkv: (3D,); w_proj: (D, D); b_proj: (D,).
    Weight convention: y = x @ W + b (torch weight transposed at setup)."""
    n, t, d = x.shape
    assert d % n_heads == 0
    hd = d // n_heads
    out_dtype = x.dtype if out_dtype is None else out_dtype
    out_bytes = jnp.dtype(out_dtype).itemsize

    bt = _pick_batch_tile(n, t, _min_grid_steps()) if batch_tile is None else batch_tile
    assert n % bt == 0, "batch_tile must divide the batch size"
    grid = (n // bt,)

    # ---- Host-side (one-time) parameter prep: fold the softmax scale into the
    # q columns/bias, cast MXU operands to bf16, stream x in bf16.
    scale = hd ** (-0.5)
    wqkv = jnp.concatenate([w_qkv[:, :d] * scale, w_qkv[:, d:]], axis=1).astype(jnp.bfloat16)
    bqkv = jnp.concatenate([b_qkv[:d] * scale, b_qkv[d:]]).reshape(1, 3 * d).astype(jnp.float32)
    wp = w_proj.astype(jnp.bfloat16)
    bp = b_proj.reshape(1, d).astype(jnp.float32)
    x_bf16 = x.astype(jnp.bfloat16)

    kernel = functools.partial(_attention_kernel, n_heads)

    def build(single_buffer_weights):
        wkw = {"pipeline_mode": pl.Buffered(1)} if single_buffer_weights else {}
        const2 = lambda i: (0, 0)
        in_specs = [
            pl.BlockSpec((bt, t, d), lambda i: (i, 0, 0)),        # x: one batch tile / step
            pl.BlockSpec((d, 3 * d), const2, **wkw),              # fused W_qkv (grid-invariant)
            pl.BlockSpec((1, 3 * d), const2, **wkw),              # b_qkv
            pl.BlockSpec((d, d), const2, **wkw),                  # W_proj
            pl.BlockSpec((1, d), const2, **wkw),                  # b_proj
        ]
        return pl.pallas_call(
            kernel,
            out_shape=jax.ShapeDtypeStruct((n, t, d), out_dtype),
            grid=grid,
            in_specs=in_specs,
            out_specs=pl.BlockSpec((bt, t, d), lambda i: (i, 0, 0)),
            scratch_shapes=[
                pltpu.VMEM((bt * t, 3 * d), jnp.bfloat16),        # fused qkv (bf16)
                pltpu.VMEM((bt * t, d), jnp.bfloat16),            # concatenated head outputs
            ],
            compiler_params=pltpu.CompilerParams(
                dimension_semantics=("parallel",),                # shard batch tiles across TCs
                vmem_limit_bytes=_vmem_limit_bytes(
                    bt, t, d, n_heads, hd, out_bytes, single_buffer_weights),
            ),
        )

    try:
        out = build(True)(x_bf16, wqkv, bqkv, wp, bp)
        return jax.block_until_ready(out)
    except Exception:
        # pl.Buffered(1) (single-buffered grid-invariant weights) not supported
        # by this jax build: fall back to default double-buffered weight specs.
        return build(False)(x_bf16, wqkv, bqkv, wp, bp)


def attention_ref(x, w_qkv, b_qkv, w_proj, b_proj, *, n_heads):
    """Pure-JAX reference mirroring the PyTorch forward (f32 end to end)."""
    n, t, d = x.shape
    hd = d // n_heads
    scale = hd ** (-0.5)
    qkv = x @ w_qkv + b_qkv                                      # (N, T, 3D)
    qkv = qkv.reshape(n, t, 3, n_heads, hd).transpose(2, 0, 3, 1, 4)
    q, k, v = qkv[0], qkv[1], qkv[2]                             # (N, H, T, hd)
    dp = jnp.einsum("nhqd,nhkd->nhqk", q, k) * scale
    attn = jax.nn.softmax(dp, axis=-1)
    wa = jnp.einsum("nhqk,nhkd->nhqd", attn, v)                  # (N, H, T, hd)
    wa = wa.transpose(0, 2, 1, 3).reshape(n, t, d)
    return wa @ w_proj + b_proj


if __name__ == "__main__":
    # Small shapes consistent with the module: batch=2, tokens=8, dim=32, heads=4.
    N, T, DIM, HEADS = 2, 8, 32, 4

    key = jax.random.PRNGKey(0)
    kx, kw1, kb1, kw2, kb2 = jax.random.split(key, 5)

    x = jax.random.normal(kx, (N, T, DIM), dtype=jnp.float32)
    w_qkv = jax.random.normal(kw1, (DIM, 3 * DIM), dtype=jnp.float32) * 0.05
    b_qkv = jax.random.normal(kb1, (3 * DIM,), dtype=jnp.float32) * 0.05
    w_proj = jax.random.normal(kw2, (DIM, DIM), dtype=jnp.float32) * 0.05
    b_proj = jax.random.normal(kb2, (DIM,), dtype=jnp.float32) * 0.05

    out = attention_pallas(x, w_qkv, b_qkv, w_proj, b_proj, n_heads=HEADS)
    out = jax.block_until_ready(out)

    ref = attention_ref(x, w_qkv, b_qkv, w_proj, b_proj, n_heads=HEADS)
    assert out.shape == (N, T, DIM)
    # bf16 MXU operands + approx reciprocal -> relaxed tolerance vs the f32 reference.
    assert jnp.allclose(out, ref, atol=2e-2, rtol=2e-2), "mismatch vs reference"

    print("KERNEL_OK")
</pallas_src>

<mosaic_0001>
module attributes {stable_mosaic.version = 11 : i64} {
  func.func @_attention_kernel(%arg0: i32, %arg1: memref<2x8x32xbf16, #tpu.memory_space<vmem>>, %arg2: memref<32x96xbf16, #tpu.memory_space<vmem>>, %arg3: memref<1x96xf32, #tpu.memory_space<vmem>>, %arg4: memref<32x32xbf16, #tpu.memory_space<vmem>>, %arg5: memref<1x32xf32, #tpu.memory_space<vmem>>, %arg6: memref<2x8x32xf32, #tpu.memory_space<vmem>>, %arg7: memref<16x96xbf16, #tpu.memory_space<vmem>>, %arg8: memref<16x32xbf16, #tpu.memory_space<vmem>>) attributes {dimension_semantics = [#tpu.dimension_semantics<parallel>], iteration_bounds = array<i64: 1>, scalar_prefetch = 0 : i64, scratch_operands = 2 : i64, tpu.core_type = #tpu.core_type<tc>, window_params = [{transform_indices = @transform_0, window_bounds = array<i64: 2, 8, 32>}, {pipeline_mode = #tpu.pipeline_mode<synchronous>, transform_indices = @transform_1, window_bounds = array<i64: 32, 96>}, {pipeline_mode = #tpu.pipeline_mode<synchronous>, transform_indices = @transform_2, window_bounds = array<i64: 1, 96>}, {pipeline_mode = #tpu.pipeline_mode<synchronous>, transform_indices = @transform_3, window_bounds = array<i64: 32, 32>}, {pipeline_mode = #tpu.pipeline_mode<synchronous>, transform_indices = @transform_4, window_bounds = array<i64: 1, 32>}, {transform_indices = @transform_5, window_bounds = array<i64: 2, 8, 32>}]} {
    %c0 = arith.constant 0 : index
    %c0_0 = arith.constant 0 : index
    %c0_1 = arith.constant 0 : index
    %0 = vector.load %arg1[%c0, %c0_0, %c0_1] : memref<2x8x32xbf16, #tpu.memory_space<vmem>>, vector<2x8x32xbf16>
    %1 = vector.shape_cast %0 : vector<2x8x32xbf16> to vector<16x32xbf16>
    %c0_2 = arith.constant 0 : index
    %c0_3 = arith.constant 0 : index
    %2 = vector.load %arg2[%c0_2, %c0_3] : memref<32x96xbf16, #tpu.memory_space<vmem>>, vector<32x96xbf16>
    %cst = arith.constant dense<0.000000e+00> : vector<16x96xf32>
    %3 = tpu.matmul %1, %2, %cst {dimension_numbers = #tpu.dot_dimension_numbers<[1], [0], [0], [1], [0, 0, 1, 1], [], []>} : vector<16x32xbf16>, vector<32x96xbf16>, vector<16x96xf32> -> vector<16x96xf32>
    %c0_4 = arith.constant 0 : index
    %c0_5 = arith.constant 0 : index
    %4 = vector.load %arg3[%c0_4, %c0_5] : memref<1x96xf32, #tpu.memory_space<vmem>>, vector<1x96xf32>
    %5 = vector.broadcast %4 : vector<1x96xf32> to vector<16x96xf32>
    %6 = arith.addf %3, %5 : vector<16x96xf32>
    %7 = arith.truncf %6 : vector<16x96xf32> to vector<16x96xbf16>
    %c0_6 = arith.constant 0 : index
    %c0_7 = arith.constant 0 : index
    %8 = vector.load %arg7[%c0_6, %c0_7] : memref<16x96xbf16, #tpu.memory_space<vmem>>, vector<16x96xbf16>
    tpu.vector_store %arg7[%c0_6, %c0_7], %7 {strides = array<i32>} : memref<16x96xbf16, #tpu.memory_space<vmem>>, vector<16x96xbf16>,
    %c0_i32 = arith.constant 0 : i32
    %c2_i32 = arith.constant 2 : i32
    %9 = arith.addi %c0_i32, %c2_i32 : i32
    %c1_i32 = arith.constant 1 : i32
    scf.for %arg9 = %c0_i32 to %9 step %c1_i32  : i32 {
      %c1_i32_19 = arith.constant 1 : i32
      %18 = arith.muli %arg9, %c1_i32_19 : i32
      %c0_i32_20 = arith.constant 0 : i32
      %19 = arith.addi %c0_i32_20, %18 : i32
      %c8_i32 = arith.constant 8 : i32
      %20 = arith.muli %19, %c8_i32 : i32
      %21 = tpu.assume_multiple %20, 8 : i32
      %22 = arith.index_cast %21 : i32 to index
      %c0_21 = arith.constant 0 : index
      %23 = vector.load %arg7[%22, %c0_21] : memref<16x96xbf16, #tpu.memory_space<vmem>>, vector<8x32xbf16>
      %24 = arith.index_cast %21 : i32 to index
      %c32 = arith.constant 32 : index
      %25 = vector.load %arg7[%24, %c32] : memref<16x96xbf16, #tpu.memory_space<vmem>>, vector<8x32xbf16>
      %26 = arith.index_cast %21 : i32 to index
      %c64 = arith.constant 64 : index
      %27 = vector.load %arg7[%26, %c64] : memref<16x96xbf16, #tpu.memory_space<vmem>>, vector<8x32xbf16>
      %28 = vector.extract_strided_slice %23 {offsets = [0, 0], sizes = [8, 8], strides = [1, 1]} : vector<8x32xbf16> to vector<8x8xbf16>
      %29 = vector.extract_strided_slice %23 {offsets = [0, 8], sizes = [8, 8], strides = [1, 1]} : vector<8x32xbf16> to vector<8x8xbf16>
      %30 = vector.extract_strided_slice %23 {offsets = [0, 16], sizes = [8, 8], strides = [1, 1]} : vector<8x32xbf16> to vector<8x8xbf16>
      %31 = vector.extract_strided_slice %23 {offsets = [0, 24], sizes = [8, 8], strides = [1, 1]} : vector<8x32xbf16> to vector<8x8xbf16>
      %32 = vector.shape_cast %28 : vector<8x8xbf16> to vector<1x8x8xbf16>
      %33 = vector.shape_cast %29 : vector<8x8xbf16> to vector<1x8x8xbf16>
      %34 = vector.shape_cast %30 : vector<8x8xbf16> to vector<1x8x8xbf16>
      %35 = vector.shape_cast %31 : vector<8x8xbf16> to vector<1x8x8xbf16>
      %36 = tpu.concatenate %32, %33, %34, %35 in 0 : vector<1x8x8xbf16>, vector<1x8x8xbf16>, vector<1x8x8xbf16>, vector<1x8x8xbf16> -> vector<4x8x8xbf16>
      %37 = vector.extract_strided_slice %25 {offsets = [0, 0], sizes = [8, 8], strides = [1, 1]} : vector<8x32xbf16> to vector<8x8xbf16>
      %38 = vector.extract_strided_slice %25 {offsets = [0, 8], sizes = [8, 8], strides = [1, 1]} : vector<8x32xbf16> to vector<8x8xbf16>
      %39 = vector.extract_strided_slice %25 {offsets = [0, 16], sizes = [8, 8], strides = [1, 1]} : vector<8x32xbf16> to vector<8x8xbf16>
      %40 = vector.extract_strided_slice %25 {offsets = [0, 24], sizes = [8, 8], strides = [1, 1]} : vector<8x32xbf16> to vector<8x8xbf16>
      %41 = vector.shape_cast %37 : vector<8x8xbf16> to vector<1x8x8xbf16>
      %42 = vector.shape_cast %38 : vector<8x8xbf16> to vector<1x8x8xbf16>
      %43 = vector.shape_cast %39 : vector<8x8xbf16> to vector<1x8x8xbf16>
      %44 = vector.shape_cast %40 : vector<8x8xbf16> to vector<1x8x8xbf16>
      %45 = tpu.concatenate %41, %42, %43, %44 in 0 : vector<1x8x8xbf16>, vector<1x8x8xbf16>, vector<1x8x8xbf16>, vector<1x8x8xbf16> -> vector<4x8x8xbf16>
      %46 = vector.extract_strided_slice %27 {offsets = [0, 0], sizes = [8, 8], strides = [1, 1]} : vector<8x32xbf16> to vector<8x8xbf16>
      %47 = vector.extract_strided_slice %27 {offsets = [0, 8], sizes = [8, 8], strides = [1, 1]} : vector<8x32xbf16> to vector<8x8xbf16>
      %48 = vector.extract_strided_slice %27 {offsets = [0, 16], sizes = [8, 8], strides = [1, 1]} : vector<8x32xbf16> to vector<8x8xbf16>
      %49 = vector.extract_strided_slice %27 {offsets = [0, 24], sizes = [8, 8], strides = [1, 1]} : vector<8x32xbf16> to vector<8x8xbf16>
      %50 = vector.shape_cast %46 : vector<8x8xbf16> to vector<1x8x8xbf16>
      %51 = vector.shape_cast %47 : vector<8x8xbf16> to vector<1x8x8xbf16>
      %52 = vector.shape_cast %48 : vector<8x8xbf16> to vector<1x8x8xbf16>
      %53 = vector.shape_cast %49 : vector<8x8xbf16> to vector<1x8x8xbf16>
      %54 = tpu.concatenate %50, %51, %52, %53 in 0 : vector<1x8x8xbf16>, vector<1x8x8xbf16>, vector<1x8x8xbf16>, vector<1x8x8xbf16> -> vector<4x8x8xbf16>
      "tpu.trace_start"() <{level = 10 : i32, message = "hqc,hkc->hqk"}> : () -> ()
      %cst_22 = arith.constant dense<0.000000e+00> : vector<4x8x8xf32>
      %55 = tpu.matmul %36, %45, %cst_22 {dimension_numbers = #tpu.dot_dimension_numbers<[2], [2], [1], [1], [0, 0, 0, 1, 1, 1], [0], [0]>} : vector<4x8x8xbf16>, vector<4x8x8xbf16>, vector<4x8x8xf32> -> vector<4x8x8xf32>
      "tpu.trace_stop"() : () -> ()
      %cst_23 = arith.constant dense<0xFF800000> : vector<4x8xf32>
      %56 = vector.multi_reduction <maximumf>, %55, %cst_23 [2] : vector<4x8x8xf32> to vector<4x8xf32>
      %57 = vector.shape_cast %56 : vector<4x8xf32> to vector<4x8x1xf32>
      %58 = vector.broadcast %57 : vector<4x8x1xf32> to vector<4x8x8xf32>
      %59 = arith.subf %55, %58 : vector<4x8x8xf32>
      %60 = math.exp %59 : vector<4x8x8xf32>
      %cst_24 = arith.constant dense<0.000000e+00> : vector<4x8xf32>
      %61 = vector.multi_reduction <add>, %60, %cst_24 [2] : vector<4x8x8xf32> to vector<4x8xf32>
      %62 = vector.shape_cast %61 : vector<4x8xf32> to vector<4x8x1xf32>
      %63 = tpu.reciprocal %62 {approx = true} : vector<4x8x1xf32> -> vector<4x8x1xf32>
      %64 = vector.broadcast %63 : vector<4x8x1xf32> to vector<4x8x8xf32>
      %65 = arith.mulf %60, %64 : vector<4x8x8xf32>
      %66 = arith.truncf %65 : vector<4x8x8xf32> to vector<4x8x8xbf16>
      "tpu.trace_start"() <{level = 10 : i32, message = "hqk,hkc->hqc"}> : () -> ()
      %cst_25 = arith.constant dense<0.000000e+00> : vector<4x8x8xf32>
      %67 = tpu.matmul %66, %54, %cst_25 {dimension_numbers = #tpu.dot_dimension_numbers<[2], [1], [1], [2], [0, 0, 0, 1, 1, 2], [0], [0]>} : vector<4x8x8xbf16>, vector<4x8x8xbf16>, vector<4x8x8xf32> -> vector<4x8x8xf32>
      "tpu.trace_stop"() : () -> ()
      %68 = vector.extract_strided_slice %67 {offsets = [0, 0, 0], sizes = [1, 8, 8], strides = [1, 1, 1]} : vector<4x8x8xf32> to vector<1x8x8xf32>
      %69 = vector.shape_cast %68 : vector<1x8x8xf32> to vector<8x8xf32>
      %70 = vector.extract_strided_slice %67 {offsets = [1, 0, 0], sizes = [1, 8, 8], strides = [1, 1, 1]} : vector<4x8x8xf32> to vector<1x8x8xf32>
      %71 = vector.shape_cast %70 : vector<1x8x8xf32> to vector<8x8xf32>
      %72 = vector.extract_strided_slice %67 {offsets = [2, 0, 0], sizes = [1, 8, 8], strides = [1, 1, 1]} : vector<4x8x8xf32> to vector<1x8x8xf32>
      %73 = vector.shape_cast %72 : vector<1x8x8xf32> to vector<8x8xf32>
      %74 = vector.extract_strided_slice %67 {offsets = [3, 0, 0], sizes = [1, 8, 8], strides = [1, 1, 1]} : vector<4x8x8xf32> to vector<1x8x8xf32>
      %75 = vector.shape_cast %74 : vector<1x8x8xf32> to vector<8x8xf32>
      %76 = tpu.concatenate %69, %71, %73, %75 in 1 : vector<8x8xf32>, vector<8x8xf32>, vector<8x8xf32>, vector<8x8xf32> -> vector<8x32xf32>
      %77 = arith.truncf %76 : vector<8x32xf32> to vector<8x32xbf16>
      %78 = arith.index_cast %21 : i32 to index
      %c0_26 = arith.constant 0 : index
      %79 = vector.load %arg8[%78, %c0_26] : memref<16x32xbf16, #tpu.memory_space<vmem>>, vector<8x32xbf16>
      tpu.vector_store %arg8[%78, %c0_26], %77 {strides = array<i32>} : memref<16x32xbf16, #tpu.memory_space<vmem>>, vector<8x32xbf16>,
    }
    %c2_i32_8 = arith.constant 2 : i32
    %c0_9 = arith.constant 0 : index
    %c0_10 = arith.constant 0 : index
    %10 = vector.load %arg8[%c0_9, %c0_10] : memref<16x32xbf16, #tpu.memory_space<vmem>>, vector<16x32xbf16>
    %c0_11 = arith.constant 0 : index
    %c0_12 = arith.constant 0 : index
    %11 = vector.load %arg4[%c0_11, %c0_12] : memref<32x32xbf16, #tpu.memory_space<vmem>>, vector<32x32xbf16>
    %cst_13 = arith.constant dense<0.000000e+00> : vector<16x32xf32>
    %12 = tpu.matmul %10, %11, %cst_13 {dimension_numbers = #tpu.dot_dimension_numbers<[1], [0], [0], [1], [0, 0, 1, 1], [], []>} : vector<16x32xbf16>, vector<32x32xbf16>, vector<16x32xf32> -> vector<16x32xf32>
    %c0_14 = arith.constant 0 : index
    %c0_15 = arith.constant 0 : index
    %13 = vector.load %arg5[%c0_14, %c0_15] : memref<1x32xf32, #tpu.memory_space<vmem>>, vector<1x32xf32>
    %14 = vector.broadcast %13 : vector<1x32xf32> to vector<16x32xf32>
    %15 = arith.addf %12, %14 : vector<16x32xf32>
    %16 = vector.shape_cast %15 : vector<16x32xf32> to vector<2x8x32xf32>
    %c0_16 = arith.constant 0 : index
    %c0_17 = arith.constant 0 : index
    %c0_18 = arith.constant 0 : index
    %17 = vector.load %arg6[%c0_16, %c0_17, %c0_18] : memref<2x8x32xf32, #tpu.memory_space<vmem>>, vector<2x8x32xf32>
    tpu.vector_store %arg6[%c0_16, %c0_17, %c0_18], %16 {strides = array<i32>} : memref<2x8x32xf32, #tpu.memory_space<vmem>>, vector<2x8x32xf32>,
    return
  }
  func.func @transform_0(%arg0: i32) -> (i32, i32, i32) {
    %c0_i32 = arith.constant 0 : i32
    %c0_i32_0 = arith.constant 0 : i32
    %c0_i32_1 = arith.constant 0 : i32
    return %arg0, %c0_i32, %c0_i32_0 : i32, i32, i32
  }
  func.func @transform_1(%arg0: i32) -> (i32, i32) {
    %c0_i32 = arith.constant 0 : i32
    %c0_i32_0 = arith.constant 0 : i32
    %c0_i32_1 = arith.constant 0 : i32
    return %c0_i32, %c0_i32_0 : i32, i32
  }
  func.func @transform_2(%arg0: i32) -> (i32, i32) {
    %c0_i32 = arith.constant 0 : i32
    %c0_i32_0 = arith.constant 0 : i32
    %c0_i32_1 = arith.constant 0 : i32
    return %c0_i32, %c0_i32_0 : i32, i32
  }
  func.func @transform_3(%arg0: i32) -> (i32, i32) {
    %c0_i32 = arith.constant 0 : i32
    %c0_i32_0 = arith.constant 0 : i32
    %c0_i32_1 = arith.constant 0 : i32
    return %c0_i32, %c0_i32_0 : i32, i32
  }
  func.func @transform_4(%arg0: i32) -> (i32, i32) {
    %c0_i32 = arith.constant 0 : i32
    %c0_i32_0 = arith.constant 0 : i32
    %c0_i32_1 = arith.constant 0 : i32
    return %c0_i32, %c0_i32_0 : i32, i32
  }
  func.func @transform_5(%arg0: i32) -> (i32, i32, i32) {
    %c0_i32 = arith.constant 0 : i32
    %c0_i32_0 = arith.constant 0 : i32
    %c0_i32_1 = arith.constant 0 : i32
    return %arg0, %c0_i32, %c0_i32_0 : i32, i32, i32
  }
}

module attributes {stable_mosaic.version = 11 : i64} {
  func.func @_attention_kernel(%arg0: i32, %arg1: memref<2x8x32xbf16, #tpu.memory_space<vmem>>, %arg2: memref<32x96xbf16, #tpu.memory_space<vmem>>, %arg3: memref<1x96xf32, #tpu.memory_space<vmem>>, %arg4: memref<32x32xbf16, #tpu.memory_space<vmem>>, %arg5: memref<1x32xf32, #tpu.memory_space<vmem>>, %arg6: memref<2x8x32xf32, #tpu.memory_space<vmem>>, %arg7: memref<16x96xbf16, #tpu.memory_space<vmem>>, %arg8: memref<16x32xbf16, #tpu.memory_space<vmem>>) attributes {dimension_semantics = [#tpu.dimension_semantics<parallel>], iteration_bounds = array<i64: 1>, scalar_prefetch = 0 : i64, scratch_operands = 2 : i64, tpu.core_type = #tpu.core_type<tc>, window_params = [{transform_indices = @transform_0, window_bounds = array<i64: 2, 8, 32>}, {pipeline_mode = #tpu.pipeline_mode<synchronous>, transform_indices = @transform_1, window_bounds = array<i64: 32, 96>}, {pipeline_mode = #tpu.pipeline_mode<synchronous>, transform_indices = @transform_2, window_bounds = array<i64: 1, 96>}, {pipeline_mode = #tpu.pipeline_mode<synchronous>, transform_indices = @transform_3, window_bounds = array<i64: 32, 32>}, {pipeline_mode = #tpu.pipeline_mode<synchronous>, transform_indices = @transform_4, window_bounds = array<i64: 1, 32>}, {transform_indices = @transform_5, window_bounds = array<i64: 2, 8, 32>}]} {
    %c0 = arith.constant 0 : index
    %c0_0 = arith.constant 0 : index
    %c0_1 = arith.constant 0 : index
    %0 = vector.load %arg1[%c0, %c0_0, %c0_1] : memref<2x8x32xbf16, #tpu.memory_space<vmem>>, vector<2x8x32xbf16>
    %1 = vector.shape_cast %0 : vector<2x8x32xbf16> to vector<16x32xbf16>
    %c0_2 = arith.constant 0 : index
    %c0_3 = arith.constant 0 : index
    %2 = vector.load %arg2[%c0_2, %c0_3] : memref<32x96xbf16, #tpu.memory_space<vmem>>, vector<32x96xbf16>
    %cst = arith.constant dense<0.000000e+00> : vector<16x96xf32>
    %3 = tpu.matmul %1, %2, %cst {dimension_numbers = #tpu.dot_dimension_numbers<[1], [0], [0], [1], [0, 0, 1, 1], [], []>} : vector<16x32xbf16>, vector<32x96xbf16>, vector<16x96xf32> -> vector<16x96xf32>
    %c0_4 = arith.constant 0 : index
    %c0_5 = arith.constant 0 : index
    %4 = vector.load %arg3[%c0_4, %c0_5] : memref<1x96xf32, #tpu.memory_space<vmem>>, vector<1x96xf32>
    %5 = vector.broadcast %4 : vector<1x96xf32> to vector<16x96xf32>
    %6 = arith.addf %3, %5 : vector<16x96xf32>
    %7 = arith.truncf %6 : vector<16x96xf32> to vector<16x96xbf16>
    %c0_6 = arith.constant 0 : index
    %c0_7 = arith.constant 0 : index
    %8 = vector.load %arg7[%c0_6, %c0_7] : memref<16x96xbf16, #tpu.memory_space<vmem>>, vector<16x96xbf16>
    tpu.vector_store %arg7[%c0_6, %c0_7], %7 {strides = array<i32>} : memref<16x96xbf16, #tpu.memory_space<vmem>>, vector<16x96xbf16>,
    %c0_i32 = arith.constant 0 : i32
    %c2_i32 = arith.constant 2 : i32
    %9 = arith.addi %c0_i32, %c2_i32 : i32
    %c1_i32 = arith.constant 1 : i32
    scf.for %arg9 = %c0_i32 to %9 step %c1_i32  : i32 {
      %c1_i32_19 = arith.constant 1 : i32
      %18 = arith.muli %arg9, %c1_i32_19 : i32
      %c0_i32_20 = arith.constant 0 : i32
      %19 = arith.addi %c0_i32_20, %18 : i32
      %c8_i32 = arith.constant 8 : i32
      %20 = arith.muli %19, %c8_i32 : i32
      %21 = tpu.assume_multiple %20, 8 : i32
      %22 = arith.index_cast %21 : i32 to index
      %c0_21 = arith.constant 0 : index
      %23 = vector.load %arg7[%22, %c0_21] : memref<16x96xbf16, #tpu.memory_space<vmem>>, vector<8x32xbf16>
      %24 = arith.index_cast %21 : i32 to index
      %c32 = arith.constant 32 : index
      %25 = vector.load %arg7[%24, %c32] : memref<16x96xbf16, #tpu.memory_space<vmem>>, vector<8x32xbf16>
      %26 = arith.index_cast %21 : i32 to index
      %c64 = arith.constant 64 : index
      %27 = vector.load %arg7[%26, %c64] : memref<16x96xbf16, #tpu.memory_space<vmem>>, vector<8x32xbf16>
      %28 = vector.extract_strided_slice %23 {offsets = [0, 0], sizes = [8, 8], strides = [1, 1]} : vector<8x32xbf16> to vector<8x8xbf16>
      %29 = vector.extract_strided_slice %23 {offsets = [0, 8], sizes = [8, 8], strides = [1, 1]} : vector<8x32xbf16> to vector<8x8xbf16>
      %30 = vector.extract_strided_slice %23 {offsets = [0, 16], sizes = [8, 8], strides = [1, 1]} : vector<8x32xbf16> to vector<8x8xbf16>
      %31 = vector.extract_strided_slice %23 {offsets = [0, 24], sizes = [8, 8], strides = [1, 1]} : vector<8x32xbf16> to vector<8x8xbf16>
      %32 = vector.shape_cast %28 : vector<8x8xbf16> to vector<1x8x8xbf16>
      %33 = vector.shape_cast %29 : vector<8x8xbf16> to vector<1x8x8xbf16>
      %34 = vector.shape_cast %30 : vector<8x8xbf16> to vector<1x8x8xbf16>
      %35 = vector.shape_cast %31 : vector<8x8xbf16> to vector<1x8x8xbf16>
      %36 = tpu.concatenate %32, %33, %34, %35 in 0 : vector<1x8x8xbf16>, vector<1x8x8xbf16>, vector<1x8x8xbf16>, vector<1x8x8xbf16> -> vector<4x8x8xbf16>
      %37 = vector.extract_strided_slice %25 {offsets = [0, 0], sizes = [8, 8], strides = [1, 1]} : vector<8x32xbf16> to vector<8x8xbf16>
      %38 = vector.extract_strided_slice %25 {offsets = [0, 8], sizes = [8, 8], strides = [1, 1]} : vector<8x32xbf16> to vector<8x8xbf16>
      %39 = vector.extract_strided_slice %25 {offsets = [0, 16], sizes = [8, 8], strides = [1, 1]} : vector<8x32xbf16> to vector<8x8xbf16>
      %40 = vector.extract_strided_slice %25 {offsets = [0, 24], sizes = [8, 8], strides = [1, 1]} : vector<8x32xbf16> to vector<8x8xbf16>
      %41 = vector.shape_cast %37 : vector<8x8xbf16> to vector<1x8x8xbf16>
      %42 = vector.shape_cast %38 : vector<8x8xbf16> to vector<1x8x8xbf16>
      %43 = vector.shape_cast %39 : vector<8x8xbf16> to vector<1x8x8xbf16>
      %44 = vector.shape_cast %40 : vector<8x8xbf16> to vector<1x8x8xbf16>
      %45 = tpu.concatenate %41, %42, %43, %44 in 0 : vector<1x8x8xbf16>, vector<1x8x8xbf16>, vector<1x8x8xbf16>, vector<1x8x8xbf16> -> vector<4x8x8xbf16>
      %46 = vector.extract_strided_slice %27 {offsets = [0, 0], sizes = [8, 8], strides = [1, 1]} : vector<8x32xbf16> to vector<8x8xbf16>
      %47 = vector.extract_strided_slice %27 {offsets = [0, 8], sizes = [8, 8], strides = [1, 1]} : vector<8x32xbf16> to vector<8x8xbf16>
      %48 = vector.extract_strided_slice %27 {offsets = [0, 16], sizes = [8, 8], strides = [1, 1]} : vector<8x32xbf16> to vector<8x8xbf16>
      %49 = vector.extract_strided_slice %27 {offsets = [0, 24], sizes = [8, 8], strides = [1, 1]} : vector<8x32xbf16> to vector<8x8xbf16>
      %50 = vector.shape_cast %46 : vector<8x8xbf16> to vector<1x8x8xbf16>
      %51 = vector.shape_cast %47 : vector<8x8xbf16> to vector<1x8x8xbf16>
      %52 = vector.shape_cast %48 : vector<8x8xbf16> to vector<1x8x8xbf16>
      %53 = vector.shape_cast %49 : vector<8x8xbf16> to vector<1x8x8xbf16>
      %54 = tpu.concatenate %50, %51, %52, %53 in 0 : vector<1x8x8xbf16>, vector<1x8x8xbf16>, vector<1x8x8xbf16>, vector<1x8x8xbf16> -> vector<4x8x8xbf16>
      "tpu.trace_start"() <{level = 10 : i32, message = "hqc,hkc->hqk"}> : () -> ()
      %cst_22 = arith.constant dense<0.000000e+00> : vector<4x8x8xf32>
      %55 = tpu.matmul %36, %45, %cst_22 {dimension_numbers = #tpu.dot_dimension_numbers<[2], [2], [1], [1], [0, 0, 0, 1, 1, 1], [0], [0]>} : vector<4x8x8xbf16>, vector<4x8x8xbf16>, vector<4x8x8xf32> -> vector<4x8x8xf32>
      "tpu.trace_stop"() : () -> ()
      %cst_23 = arith.constant dense<0xFF800000> : vector<4x8xf32>
      %56 = vector.multi_reduction <maximumf>, %55, %cst_23 [2] : vector<4x8x8xf32> to vector<4x8xf32>
      %57 = vector.shape_cast %56 : vector<4x8xf32> to vector<4x8x1xf32>
      %58 = vector.broadcast %57 : vector<4x8x1xf32> to vector<4x8x8xf32>
      %59 = arith.subf %55, %58 : vector<4x8x8xf32>
      %60 = math.exp %59 : vector<4x8x8xf32>
      %cst_24 = arith.constant dense<0.000000e+00> : vector<4x8xf32>
      %61 = vector.multi_reduction <add>, %60, %cst_24 [2] : vector<4x8x8xf32> to vector<4x8xf32>
      %62 = vector.shape_cast %61 : vector<4x8xf32> to vector<4x8x1xf32>
      %63 = tpu.reciprocal %62 {approx = true} : vector<4x8x1xf32> -> vector<4x8x1xf32>
      %64 = vector.broadcast %63 : vector<4x8x1xf32> to vector<4x8x8xf32>
      %65 = arith.mulf %60, %64 : vector<4x8x8xf32>
      %66 = arith.truncf %65 : vector<4x8x8xf32> to vector<4x8x8xbf16>
      "tpu.trace_start"() <{level = 10 : i32, message = "hqk,hkc->hqc"}> : () -> ()
      %cst_25 = arith.constant dense<0.000000e+00> : vector<4x8x8xf32>
      %67 = tpu.matmul %66, %54, %cst_25 {dimension_numbers = #tpu.dot_dimension_numbers<[2], [1], [1], [2], [0, 0, 0, 1, 1, 2], [0], [0]>} : vector<4x8x8xbf16>, vector<4x8x8xbf16>, vector<4x8x8xf32> -> vector<4x8x8xf32>
      "tpu.trace_stop"() : () -> ()
      %68 = vector.extract_strided_slice %67 {offsets = [0, 0, 0], sizes = [1, 8, 8], strides = [1, 1, 1]} : vector<4x8x8xf32> to vector<1x8x8xf32>
      %69 = vector.shape_cast %68 : vector<1x8x8xf32> to vector<8x8xf32>
      %70 = vector.extract_strided_slice %67 {offsets = [1, 0, 0], sizes = [1, 8, 8], strides = [1, 1, 1]} : vector<4x8x8xf32> to vector<1x8x8xf32>
      %71 = vector.shape_cast %70 : vector<1x8x8xf32> to vector<8x8xf32>
      %72 = vector.extract_strided_slice %67 {offsets = [2, 0, 0], sizes = [1, 8, 8], strides = [1, 1, 1]} : vector<4x8x8xf32> to vector<1x8x8xf32>
      %73 = vector.shape_cast %72 : vector<1x8x8xf32> to vector<8x8xf32>
      %74 = vector.extract_strided_slice %67 {offsets = [3, 0, 0], sizes = [1, 8, 8], strides = [1, 1, 1]} : vector<4x8x8xf32> to vector<1x8x8xf32>
      %75 = vector.shape_cast %74 : vector<1x8x8xf32> to vector<8x8xf32>
      %76 = tpu.concatenate %69, %71, %73, %75 in 1 : vector<8x8xf32>, vector<8x8xf32>, vector<8x8xf32>, vector<8x8xf32> -> vector<8x32xf32>
      %77 = arith.truncf %76 : vector<8x32xf32> to vector<8x32xbf16>
      %78 = arith.index_cast %21 : i32 to index
      %c0_26 = arith.constant 0 : index
      %79 = vector.load %arg8[%78, %c0_26] : memref<16x32xbf16, #tpu.memory_space<vmem>>, vector<8x32xbf16>
      tpu.vector_store %arg8[%78, %c0_26], %77 {strides = array<i32>} : memref<16x32xbf16, #tpu.memory_space<vmem>>, vector<8x32xbf16>,
    }
    %c2_i32_8 = arith.constant 2 : i32
    %c0_9 = arith.constant 0 : index
    %c0_10 = arith.constant 0 : index
    %10 = vector.load %arg8[%c0_9, %c0_10] : memref<16x32xbf16, #tpu.memory_space<vmem>>, vector<16x32xbf16>
    %c0_11 = arith.constant 0 : index
    %c0_12 = arith.constant 0 : index
    %11 = vector.load %arg4[%c0_11, %c0_12] : memref<32x32xbf16, #tpu.memory_space<vmem>>, vector<32x32xbf16>
    %cst_13 = arith.constant dense<0.000000e+00> : vector<16x32xf32>
    %12 = tpu.matmul %10, %11, %cst_13 {dimension_numbers = #tpu.dot_dimension_numbers<[1], [0], [0], [1], [0, 0, 1, 1], [], []>} : vector<16x32xbf16>, vector<32x32xbf16>, vector<16x32xf32> -> vector<16x32xf32>
    %c0_14 = arith.constant 0 : index
    %c0_15 = arith.constant 0 : index
    %13 = vector.load %arg5[%c0_14, %c0_15] : memref<1x32xf32, #tpu.memory_space<vmem>>, vector<1x32xf32>
    %14 = vector.broadcast %13 : vector<1x32xf32> to vector<16x32xf32>
    %15 = arith.addf %12, %14 : vector<16x32xf32>
    %16 = vector.shape_cast %15 : vector<16x32xf32> to vector<2x8x32xf32>
    %c0_16 = arith.constant 0 : index
    %c0_17 = arith.constant 0 : index
    %c0_18 = arith.constant 0 : index
    %17 = vector.load %arg6[%c0_16, %c0_17, %c0_18] : memref<2x8x32xf32, #tpu.memory_space<vmem>>, vector<2x8x32xf32>
    tpu.vector_store %arg6[%c0_16, %c0_17, %c0_18], %16 {strides = array<i32>} : memref<2x8x32xf32, #tpu.memory_space<vmem>>, vector<2x8x32xf32>,
    return
  }
  func.func @transform_0(%arg0: i32) -> (i32, i32, i32) {
    %c0_i32 = arith.constant 0 : i32
    %c0_i32_0 = arith.constant 0 : i32
    %c0_i32_1 = arith.constant 0 : i32
    return %arg0, %c0_i32, %c0_i32_0 : i32, i32, i32
  }
  func.func @transform_1(%arg0: i32) -> (i32, i32) {
    %c0_i32 = arith.constant 0 : i32
    %c0_i32_0 = arith.constant 0 : i32
    %c0_i32_1 = arith.constant 0 : i32
    return %c0_i32, %c0_i32_0 : i32, i32
  }
  func.func @transform_2(%arg0: i32) -> (i32, i32) {
    %c0_i32 = arith.constant 0 : i32
    %c0_i32_0 = arith.constant 0 : i32
    %c0_i32_1 = arith.constant 0 : i32
    return %c0_i32, %c0_i32_0 : i32, i32
  }
  func.func @transform_3(%arg0: i32) -> (i32, i32) {
    %c0_i32 = arith.constant 0 : i32
    %c0_i32_0 = arith.constant 0 : i32
    %c0_i32_1 = arith.constant 0 : i32
    return %c0_i32, %c0_i32_0 : i32, i32
  }
  func.func @transform_4(%arg0: i32) -> (i32, i32) {
    %c0_i32 = arith.constant 0 : i32
    %c0_i32_0 = arith.constant 0 : i32
    %c0_i32_1 = arith.constant 0 : i32
    return %c0_i32, %c0_i32_0 : i32, i32
  }
  func.func @transform_5(%arg0: i32) -> (i32, i32, i32) {
    %c0_i32 = arith.constant 0 : i32
    %c0_i32_0 = arith.constant 0 : i32
    %c0_i32_1 = arith.constant 0 : i32
    return %arg0, %c0_i32, %c0_i32_0 : i32, i32, i32
  }
}

</mosaic_0001>

<bundles_post_ra>
// kernel: tpu_custom_call.1
= control target key start
LH: loop header
LB: loop body
LE: loop exit
PB: predicated region body
PF: predicated region fallthrough
CT: control target
= control target key end

     0   :  { %10 = vsyncpa [#allocation5], 0  ;;  %s773_s0 = inlined_call_operand.hbm [shape: bf16[2,8,32], index: 0, kind: input, shape index: {}]   ;;  %s774_s1 = inlined_call_operand.hbm [shape: bf16[32,96], index: 1, kind: input, shape index: {}]   ;;  %s775_s2 = inlined_call_operand.vmem [shape: f32[1,96], index: 2, kind: input, shape index: {}]   ;;  %s776_s3 = inlined_call_operand.hbm [shape: bf16[32,32], index: 3, kind: input, shape index: {}]   ;;  %s777_s4 = inlined_call_operand.vmem [shape: f32[1,32], index: 4, kind: input, shape index: {}]   ;;  %s778_s5 = inlined_call_operand.hbm [shape: f32[2,8,32], index: 5, kind: output, shape index: {}]  }
   0x1   :  { %11 = vsyncpa [#allocation8], 0 }
   0x2   :  { %12 = vsyncpa [#allocation6], 0  ;;  %s30_s20 = sshll.u32 %s774_s1, 4  ;;  %s656_s21 = smov [#allocation7]   ;;  %s31_s20 = int_to_ptr.hbm [resolvable:$true] %s30_s20 }
   0x3   :  { %s32_s22 = sshll.u32 %s656_s21, 4  ;;  %s17_s25 = sshll.u32 %s773_s0, 4  ;;  %s33_s22 = int_to_ptr.vmem [resolvable:$true] %s32_s22  ;;  %s18_s25 = int_to_ptr.hbm [resolvable:$true] %s17_s25 }
   0x4   :  { %s657_s26 = smov 64   ;;  %s658_s27 = smov 4  }
   0x5   :  { %38 = dma.hbm_to_vmem [thread:$0]  %s31_s20, 256, %s33_s22, [#allocation8], %s657_s26, %s657_s26, %s658_s27  }
   0x6   :  { %s659_s28 = smov [#allocation4]   ;;  %s45_s7 = sshll.u32 %s776_s3, 4  ;;  %s46_s7 = int_to_ptr.hbm [resolvable:$true] %s45_s7 }
   0x7   :  { %s19_s29 = sshll.u32 %s659_s28, 4  ;;  %s660_s1 = smov [#allocation9]   ;;  %s20_s29 = int_to_ptr.vmem [resolvable:$true] %s19_s29 }
   0x8   :  { %25 = dma.hbm_to_vmem [thread:$0]  %s18_s25, 128, %s20_s29, [#allocation5], %s657_s26, %s657_s26, %s658_s27  }
   0x9   :  { %s47_s8 = sshll.u32 %s660_s1, 4  ;;  %s48_s8 = int_to_ptr.vmem [resolvable:$true] %s47_s8 }
   0xa   :  { %53 = dma.hbm_to_vmem [thread:$0]  %s46_s7, 256, %s48_s8, [#allocation8], %s657_s26, %s657_s26, %s658_s27  }
   0xb   :  { %646 = dma.done.wait [#allocation5], 128  }
   0xc   :  { %647 = vsyncadd [#allocation5], 4294967168 }
   0xd   :  { %648 = dma.done.wait [#allocation8], 512  }
   0xe   :  { %649 = vsyncadd [#allocation8], 4294966784  ;;  %v500_v0 = vld [vmem:[#allocation7 + $0x8] sm:$0xff]  ;;  %v499_v1 = vld [vmem:[#allocation7] sm:$0xff]  ;;  %vm96_vm0 = vcmask 261120   ;;  %vm116_vm1 = vcmask 781312  }
   0xf   :  { %106 = vmatpush.bf16.msra.mxu0 %v500_v0  ;;  %v498_v2 = vld [vmem:[#allocation4] sm:$0xff]  ;;  %v528_v3 = vld [vmem:[%s775_s2] ss:$0 sm:$0xff]  ;;  %s715_s9 = smov 0  }
  0x13   :  { %107 = vmatpush.bf16.msra.mxu0 %v499_v1 }
  0x16   :  { %473 = vmatmul.msk.bf16.vlgmr.msra.gmra.mxu0 %vm96_vm0, %v498_v2 }
  0x93   :  { %v109_v4 = vpop.f32.mrf.mxu0 }
  0x94   :  { %v110_v5 = vadd.f32 %v528_v3, %v109_v4 }
  0x96   :  { %v114_v6 = vpack.c.bf16 %v110_v5, %v110_v5 }
  0x98   :  { %117 = vst.msk [vmem:[#allocation2] sm:$0xf] %vm116_vm1, %v114_v6 }
  0x9b   :  { %v111_v7 = vpop.f32.mrf.mxu0 }
  0x9c   :  { %v112_v8 = vadd.f32 %v528_v3, %v111_v7 }
  0x9e   :  { %v115_v9 = vpack.c.bf16 %v112_v8, %v112_v8 }
  0xa0   :  { %118 = vst.msk [vmem:[#allocation2 + $0x4] sm:$0xf] %vm116_vm1, %v115_v9 }
  0xa1 LB: > { %s474_s10 = sshll.u32 %s654_s9, 3  ;;  %s661_s13 = smov 112   ;;  %vm142_vm2 = vcmask 64512   ;;  %vm284_vm3 = vcmask 1043456   ;;  %vm377_vm4 = vcmask 130048   ;;  %vm379_vm5 = vcmask 195584   ;;  %s654_s9 = sphi %s715_s9, %s124_s9  }
  0xa2   : > { %s721_s11 = sshra.s32 %s474_s10, 3  ;;  %s662_s14 = smov 120   ;;  %vm384_vm6 = vcmask 257024  }
  0xa3   : > { %s475_s2 = sshll.u32 %s721_s11, 2  ;;  %s663_s15 = smov 104  }
  0xa4   : > { %s129_s12 = scalar_lea.vmem [#allocation2], %s475_s2  ;;  %s664_s16 = smov 96  }
  0xa5   : > { %s665_s17 = smov 64   ;;  %s666_s18 = smov 8  }
  0xa6   : > { %s667_s19 = smov 24   ;;  %s668_s20 = smov 16  }
  0xa7   : > { %v130_v10 = vld [vmem:[%s129_s12] sm:$0xf]  ;;  %s383_s21 = scalar_lea.vmem [#allocation3], %s475_s2  ;;  %s124_s9 = sadd.s32 1, %s654_s9  }
  0xa8   : > { %134 = vrot.lane.b32.xlu0 %v130_v10, %s661_s13  ;;  %132 = vrot.lane.b32.xlu1 %v130_v10, %s662_s14  ;;  %v138_v11 = vunpack.c.l.b16 %v130_v10  ;;  %p121_p0 = scmp.ge.s32.totalorder %s124_s9, 2  }
  0xa9   :  { %s669_s24 = smov (%p121_p0), [#allocation10]   ;;  %s438_s28 = sshll.u32 (%p121_p0), %s778_s5, 4  ;;  %s439_s28 = int_to_ptr.hbm [resolvable:$true] %s438_s28 }
  0xaa   : > { %v726_v12 = vpack.c.b16 %v138_v11, %v138_v11  ;;  %s436_s25 = sshll.u32 (%p121_p0), %s669_s24, 4  ;;  %s670_s29 = smov (%p121_p0), 128   ;;  %s437_s25 = int_to_ptr.vmem [resolvable:$true] %s436_s25 }
  0xab   :  { %s671_s30 = smov (%p121_p0), 8  }
  0xb0   : > { %136 = vrot.lane.b32.xlu0 %v130_v10, %s663_s15 }
  0xb8   : > { %140 = vrot.lane.b32.xlu0 %v726_v12, %s664_s16 }
 0x11a   : > { %v135_v13 = vpop.permute.xlu0 %134  ;;  %v133_v18 = vpop.permute.xlu1 %132 }
 0x11b   : > { %v185_v14 = vunpack.c.l.b16 %v135_v13  ;;  %v162_v20 = vunpack.c.l.b16 %v133_v18 }
 0x11d   : > { %v729_v15 = vpack.c.b16 %v185_v14, %v185_v14  ;;  %v163_v21 = vpack.c.b16 %v162_v20, %v162_v20 }
 0x11f   : > { %187 = vrot.lane.b32.xlu1 %v729_v15, %s664_s16 }
 0x122   : > { %v137_v16 = vpop.permute.xlu0 %136 }
 0x123   : > { %v208_v17 = vunpack.c.l.b16 %v137_v16 }
 0x125   : > { %v209_v19 = vpack.c.b16 %v208_v17, %v208_v17 }
 0x127   : > { %210 = vrot.lane.b32.xlu2 %v209_v19, %s664_s16 }
 0x12a   : > { %v141_v24 = vpop.permute.xlu0 %140 }
 0x12b   : > { %v147_v25 = vsel %vm142_vm2, %v141_v24, 0 }
 0x12c   : > { %156 = vmatpush.bf16.xpose.msra.mxu0 %v147_v25 }
 0x12f   : > { %164 = vrot.lane.b32.xlu2 %v163_v21, %s664_s16 }
 0x133   : > { %476 = vmatmul.msk.bf16.vlgmr.msra.gmra.mxu0 %vm142_vm2, %v130_v10 }
 0x181   : > { %v211_v22 = vpop.permute.xlu2 %210 }
 0x182   : > { %v216_v23 = vsel %vm142_vm2, %v211_v22, 0 }
 0x183   : > { %225 = vmatpush.bf16.xpose.msra.mxu3 %v216_v23 }
 0x189   : > { %v165_v26 = vpop.permute.xlu2 %164 }
 0x18a   : > { %479 = vmatmul.msk.bf16.vlgmr.msra.gmra.mxu3 %vm142_vm2, %v137_v16  ;;  %v170_v27 = vsel %vm142_vm2, %v165_v26, 0 }
 0x18b   : > { %179 = vmatpush.bf16.xpose.msra.mxu1 %v170_v27 }
 0x191   : > { %v188_v28 = vpop.permute.xlu1 %187 }
 0x192   : > { %477 = vmatmul.msk.bf16.vlgmr.msra.gmra.mxu1 %vm142_vm2, %v133_v18  ;;  %v193_v29 = vsel %vm142_vm2, %v188_v28, 0 }
 0x193   : > { %202 = vmatpush.bf16.xpose.msra.mxu2 %v193_v29 }
 0x19a   : > { %478 = vmatmul.msk.bf16.vlgmr.msra.gmra.mxu2 %vm142_vm2, %v135_v13 }
 0x1b0   : > { %v158_v30 = vpop.f32.mrf.mxu0 }
 0x1b1   : > { %v231_v36 = vsel %vm142_vm2, %v158_v30, -inf }
 0x1b8   : > { %v160_v35 = vpop.f32.mrf.mxu0 }
 0x20d   : > { %v227_v31 = vpop.f32.mrf.mxu3 }
 0x20e   : > { %v240_v32 = vsel %vm142_vm2, %v227_v31, -inf }
 0x20f   : > { %241 = vmax.xlane.f32.xlu2 %v240_v32  ;;  %v181_v33 = vpop.f32.mrf.mxu1 }
 0x210   : > { %v234_v34 = vsel %vm142_vm2, %v181_v33, -inf }
 0x211   : > { %235 = vmax.xlane.f32.xlu0 %v234_v34 }
 0x215   : > { %v229_v37 = vpop.f32.mrf.mxu3 }
 0x216   :  { %v503_v37 = vld [vmem:[#allocation9 + $0x8] sm:$0xff] (%p121_p0) }
 0x217   : > { %v183_v38 = vpop.f32.mrf.mxu1  ;;  %232 = vmax.xlane.f32.xlu2 %v231_v36 }
 0x218   :  { %v502_v38 = vld [vmem:[#allocation9] sm:$0xff] (%p121_p0) }
 0x21d   : > { %v204_v39 = vpop.f32.mrf.mxu2 }
 0x21e   : > { %v237_v40 = vsel %vm142_vm2, %v204_v39, -inf }
 0x21f   : > { %238 = vmax.xlane.f32.xlu1 %v237_v40  ;;  %v545_v40 = vld [vmem:[%s777_s4] ss:$0 sm:$0xff] (%p121_p0) }
 0x225   : > { %v206_v41 = vpop.f32.mrf.mxu2 }
 0x282   : > { %v242_v42 = vpop.xlane.xlu2 %241 }
 0x283   : > { %v246_v43 = vsub.f32 %v227_v31, %v242_v42 }
 0x284   : > { %v236_v44 = vpop.xlane.xlu0 %235 }
 0x285   : > { %v253_v45 = vmul.f32 1.442695, %v246_v43  ;;  %v244_v46 = vsub.f32 %v181_v33, %v236_v44 }
 0x287   : > { %529 = vpow2.f32 %v253_v45  ;;  %v249_v47 = vmul.f32 1.442695, %v244_v46 }
 0x289   : > { %531 = vpow2.f32 %v249_v47 }
 0x28a   : > { %v233_v57 = vpop.xlane.xlu2 %232 }
 0x28b   : > { %v243_v58 = vsub.f32 %v158_v30, %v233_v57 }
 0x28d   : > { %v530_v48 = vpop.eup %529  ;;  %v247_v59 = vmul.f32 1.442695, %v243_v58 }
 0x28e   : > { %v264_v49 = vsel %vm142_vm2, %v530_v48, 0.0 }
 0x28f   : > { %v532_v50 = vpop.eup %531  ;;  %265 = vadd.xlane.f32.xlu2 %v264_v49 }
 0x290   : > { %v258_v51 = vsel %vm142_vm2, %v532_v50, 0.0 }
 0x291   : > { %259 = vadd.xlane.f32.xlu0 %v258_v51 }
 0x292   : > { %v239_v52 = vpop.xlane.xlu1 %238 }
 0x293   : > { %v245_v53 = vsub.f32 %v204_v39, %v239_v52 }
 0x295   : > { %v251_v54 = vmul.f32 1.442695, %v245_v53 }
 0x297   : > { %533 = vpow2.f32 %v251_v54 }
 0x298   : > { %535 = vpow2.f32 %v247_v59 }
 0x29d   : > { %v534_v55 = vpop.eup %533 }
 0x29e   : > { %v261_v56 = vsel %vm142_vm2, %v534_v55, 0.0  ;;  %v536_v60 = vpop.eup %535 }
 0x29f   : > { %262 = vadd.xlane.f32.xlu1 %v261_v56  ;;  %v255_v61 = vsel %vm142_vm2, %v536_v60, 0.0 }
 0x2a5   : > { %301 = vrot.lane.b32.xlu0 %v163_v21, %s665_s17 }
 0x2a7   : > { %343 = vrot.lane.b32.xlu2 %v209_v19, %s665_s17 }
 0x2ad   : > { %279 = vrot.lane.b32.xlu0 %v726_v12, %s665_s17 }
 0x2b8   : > { %322 = vrot.lane.b32.xlu1 %v729_v15, %s665_s17 }
 0x2e2   : > { %256 = vadd.xlane.f32.xlu1 %v255_v61 }
 0x302   : > { %v266_v62 = vpop.xlane.xlu2 %265 }
 0x303   : > { %537 = vrcp.f32 %v266_v62 }
 0x304   : > { %v260_v1 = vpop.xlane.xlu0 %259 }
 0x305   : > { %539 = vrcp.f32 %v260_v1 }
 0x309   : > { %v538_v63 = vpop.eup %537 }
 0x30a   : > { %v274_v0 = vmul.f32 %v538_v63, %v530_v48  ;;  %v344_v2 = vpop.permute.xlu2 %343 }
 0x30b   : > { %v349_v3 = vsel %vm284_vm3, %v344_v2, 0  ;;  %v540_v5 = vpop.eup %539 }
 0x30c   : > { %358 = vmatpush.bf16.msrb.mxu3 %v349_v3  ;;  %v278_v4 = vpack.c.bf16 %v274_v0, %v274_v0  ;;  %v272_v6 = vmul.f32 %v540_v5, %v532_v50 }
 0x30e   : > { %v276_v9 = vpack.c.bf16 %v272_v6, %v272_v6 }
 0x30f   : > { %483 = vmatmul.msk.bf16.vlgmr.msrb.gmra.mxu3 %vm142_vm2, %v278_v4 }
 0x312   : > { %v263_v10 = vpop.xlane.xlu1 %262 }
 0x313   : > { %541 = vrcp.f32 %v263_v10 }
 0x317   : > { %v302_v7 = vpop.permute.xlu0 %301 }
 0x318   : > { %v307_v8 = vsel %vm284_vm3, %v302_v7, 0 }
 0x319   : > { %316 = vmatpush.bf16.msrb.mxu1 %v307_v8  ;;  %v542_v11 = vpop.eup %541 }
 0x31a   : > { %v273_v12 = vmul.f32 %v542_v11, %v534_v55 }
 0x31c   : > { %481 = vmatmul.msk.bf16.vlgmr.msrb.gmra.mxu1 %vm142_vm2, %v276_v9  ;;  %v277_v15 = vpack.c.bf16 %v273_v12, %v273_v12 }
 0x31f   : > { %v280_v16 = vpop.permute.xlu0 %279 }
 0x320   : > { %v286_v17 = vsel %vm284_vm3, %v280_v16, 0 }
 0x321   : > { %295 = vmatpush.bf16.msrb.mxu0 %v286_v17 }
 0x325   :  { %422 = vmatpush.bf16.msra.mxu0 (%p121_p0), %v503_v37 }
 0x329   :  { %423 = vmatpush.bf16.msra.mxu0 (%p121_p0), %v502_v38 }
 0x32a   : > { %v323_v13 = vpop.permute.xlu1 %322 }
 0x32b   : > { %v328_v14 = vsel %vm284_vm3, %v323_v13, 0 }
 0x32c   : > { %337 = vmatpush.bf16.msrb.mxu2 %v328_v14 }
 0x32f   : > { %482 = vmatmul.msk.bf16.vlgmr.msrb.gmra.mxu2 %vm142_vm2, %v277_v15 }
 0x355   : > { %v257_v18 = vpop.xlane.xlu1 %256 }
 0x356   : > { %543 = vrcp.f32 %v257_v18 }
 0x35c   : > { %v544_v19 = vpop.eup %543 }
 0x35d   : > { %v271_v20 = vmul.f32 %v544_v19, %v536_v60 }
 0x35f   : > { %v275_v21 = vpack.c.bf16 %v271_v20, %v271_v20 }
 0x361   : > { %480 = vmatmul.msk.bf16.vlgmr.msrb.gmra.mxu0 %vm142_vm2, %v275_v21 }
 0x392   : > { %v360_v22 = vpop.f32.mrf.mxu3 }
 0x399   : > { %v318_v23 = vpop.f32.mrf.mxu1 }
 0x39a   : > { %v362_v24 = vpop.f32.mrf.mxu3  ;;  %365 = vrot.lane.b32.xlu2 %v318_v23, %s666_s18 }
 0x3a1   : > { %v320_v25 = vpop.f32.mrf.mxu1 }
 0x3a2   : > { %373 = vrot.lane.b32.xlu2 %v360_v22, %s667_s19 }
 0x3b2   : > { %v339_v26 = vpop.f32.mrf.mxu2 }
 0x3b3   : > { %369 = vrot.lane.b32.xlu0 %v339_v26, %s668_s20 }
 0x3ba   : > { %v341_v27 = vpop.f32.mrf.mxu2 }
 0x3de   : > { %v297_v28 = vpop.f32.mrf.mxu0 }
 0x3e6   : > { %v299_v29 = vpop.f32.mrf.mxu0 }
 0x3f4   : > { %v366_v30 = vpop.permute.xlu2 %365 }
 0x3f5   : > { %v376_v31 = vsel %vm142_vm2, %v297_v28, %v366_v30 }
 0x3fc   : > { %v374_v33 = vpop.permute.xlu2 %373 }
 0x425   : > { %v370_v32 = vpop.permute.xlu0 %369 }
 0x426   : > { %v378_v34 = vsel %vm377_vm4, %v376_v31, %v370_v32  ;;  %123 = sbr.rel (!%p121_p0) target bundleno = 161 (0xa1), region = 61 }
 0x427   : > { %v380_v35 = vsel %vm379_vm5, %v378_v34, %v374_v33 }
 0x428   : > { %v381_v36 = vpack.c.bf16 %v380_v35, %v380_v35 }
 0x42a   : > { %385 = vst.msk [vmem:[%s383_s21] sm:$0xf] %vm384_vm6, %v381_v36 }
 0x431   :  { %v501_v39 = vld [vmem:[#allocation3] sm:$0xff] }
 0x432   :  { %497 = vmatmul.msk.bf16.vlgmr.msra.gmra.mxu0 %vm96_vm0, %v501_v39 }
 0x4af   :  { %v425_v41 = vpop.f32.mrf.mxu0 }
 0x4b0   :  { %v426_v42 = vadd.f32 %v545_v40, %v425_v41 }
 0x4b2   :  { %430 = vst.msk [vmem:[#allocation10] sm:$0xff] %vm96_vm0, %v426_v42 }
 0x4b7   :  { %v427_v43 = vpop.f32.mrf.mxu0 }
 0x4b8   :  { %v428_v44 = vadd.f32 %v545_v40, %v427_v43 }
 0x4ba   :  { %431 = vst.msk [vmem:[#allocation10 + $0x8] sm:$0xff] %vm96_vm0, %v428_v44 }
 0x4bb   :  { %444 = dma.vmem_to_hbm [thread:$0]  %s437_s25, 256, %s439_s28, [#allocation6], %s670_s29, %s670_s29, %s671_s30  }
 0x4bc   :  { %650 = dma.done.wait [#allocation6], 256  }
 0x4bd   :  { %651 = vsyncadd [#allocation6], 4294967040 }
 0x4be   :  { %449 = vsyncpa [#allocation5], 1 }
 0x4bf   :  { %450 = vsyncpa [#allocation8], 1 }
 0x4c0   :  { %451 = vsyncpa [#allocation6], 1 }

// kernel: tpu_custom_call.1
= control target key start
LH: loop header
LB: loop body
LE: loop exit
PB: predicated region body
PF: predicated region fallthrough
CT: control target
= control target key end

     0   :  { %10 = vsyncpa [#allocation5], 0  ;;  %s773_s0 = inlined_call_operand.hbm [shape: bf16[2,8,32], index: 0, kind: input, shape index: {}]   ;;  %s774_s1 = inlined_call_operand.hbm [shape: bf16[32,96], index: 1, kind: input, shape index: {}]   ;;  %s775_s2 = inlined_call_operand.vmem [shape: f32[1,96], index: 2, kind: input, shape index: {}]   ;;  %s776_s3 = inlined_call_operand.hbm [shape: bf16[32,32], index: 3, kind: input, shape index: {}]   ;;  %s777_s4 = inlined_call_operand.vmem [shape: f32[1,32], index: 4, kind: input, shape index: {}]   ;;  %s778_s5 = inlined_call_operand.hbm [shape: f32[2,8,32], index: 5, kind: output, shape index: {}]  }
   0x1   :  { %11 = vsyncpa [#allocation8], 0 }
   0x2   :  { %12 = vsyncpa [#allocation6], 0  ;;  %s30_s20 = sshll.u32 %s774_s1, 4  ;;  %s656_s21 = smov [#allocation7]   ;;  %s31_s20 = int_to_ptr.hbm [resolvable:$true] %s30_s20 }
   0x3   :  { %s32_s22 = sshll.u32 %s656_s21, 4  ;;  %s17_s25 = sshll.u32 %s773_s0, 4  ;;  %s33_s22 = int_to_ptr.vmem [resolvable:$true] %s32_s22  ;;  %s18_s25 = int_to_ptr.hbm [resolvable:$true] %s17_s25 }
   0x4   :  { %s657_s26 = smov 64   ;;  %s658_s27 = smov 4  }
   0x5   :  { %38 = dma.hbm_to_vmem [thread:$0]  %s31_s20, 256, %s33_s22, [#allocation8], %s657_s26, %s657_s26, %s658_s27  }
   0x6   :  { %s659_s28 = smov [#allocation4]   ;;  %s45_s7 = sshll.u32 %s776_s3, 4  ;;  %s46_s7 = int_to_ptr.hbm [resolvable:$true] %s45_s7 }
   0x7   :  { %s19_s29 = sshll.u32 %s659_s28, 4  ;;  %s660_s1 = smov [#allocation9]   ;;  %s20_s29 = int_to_ptr.vmem [resolvable:$true] %s19_s29 }
   0x8   :  { %25 = dma.hbm_to_vmem [thread:$0]  %s18_s25, 128, %s20_s29, [#allocation5], %s657_s26, %s657_s26, %s658_s27  }
   0x9   :  { %s47_s8 = sshll.u32 %s660_s1, 4  ;;  %s48_s8 = int_to_ptr.vmem [resolvable:$true] %s47_s8 }
   0xa   :  { %53 = dma.hbm_to_vmem [thread:$0]  %s46_s7, 256, %s48_s8, [#allocation8], %s657_s26, %s657_s26, %s658_s27  }
   0xb   :  { %646 = dma.done.wait [#allocation5], 128  }
   0xc   :  { %647 = vsyncadd [#allocation5], 4294967168 }
   0xd   :  { %648 = dma.done.wait [#allocation8], 512  }
   0xe   :  { %649 = vsyncadd [#allocation8], 4294966784  ;;  %v500_v0 = vld [vmem:[#allocation7 + $0x8] sm:$0xff]  ;;  %v499_v1 = vld [vmem:[#allocation7] sm:$0xff]  ;;  %vm96_vm0 = vcmask 261120   ;;  %vm116_vm1 = vcmask 781312  }
   0xf   :  { %106 = vmatpush.bf16.msra.mxu0 %v500_v0  ;;  %v498_v2 = vld [vmem:[#allocation4] sm:$0xff]  ;;  %v528_v3 = vld [vmem:[%s775_s2] ss:$0 sm:$0xff]  ;;  %s715_s9 = smov 0  }
  0x13   :  { %107 = vmatpush.bf16.msra.mxu0 %v499_v1 }
  0x16   :  { %473 = vmatmul.msk.bf16.vlgmr.msra.gmra.mxu0 %vm96_vm0, %v498_v2 }
  0x93   :  { %v109_v4 = vpop.f32.mrf.mxu0 }
  0x94   :  { %v110_v5 = vadd.f32 %v528_v3, %v109_v4 }
  0x96   :  { %v114_v6 = vpack.c.bf16 %v110_v5, %v110_v5 }
  0x98   :  { %117 = vst.msk [vmem:[#allocation2] sm:$0xf] %vm116_vm1, %v114_v6 }
  0x9b   :  { %v111_v7 = vpop.f32.mrf.mxu0 }
  0x9c   :  { %v112_v8 = vadd.f32 %v528_v3, %v111_v7 }
  0x9e   :  { %v115_v9 = vpack.c.bf16 %v112_v8, %v112_v8 }
  0xa0   :  { %118 = vst.msk [vmem:[#allocation2 + $0x4] sm:$0xf] %vm116_vm1, %v115_v9 }
  0xa1 LB: > { %s474_s10 = sshll.u32 %s654_s9, 3  ;;  %s661_s13 = smov 112   ;;  %vm142_vm2 = vcmask 64512   ;;  %vm284_vm3 = vcmask 1043456   ;;  %vm377_vm4 = vcmask 130048   ;;  %vm379_vm5 = vcmask 195584   ;;  %s654_s9 = sphi %s715_s9, %s124_s9  }
  0xa2   : > { %s721_s11 = sshra.s32 %s474_s10, 3  ;;  %s662_s14 = smov 120   ;;  %vm384_vm6 = vcmask 257024  }
  0xa3   : > { %s475_s2 = sshll.u32 %s721_s11, 2  ;;  %s663_s15 = smov 104  }
  0xa4   : > { %s129_s12 = scalar_lea.vmem [#allocation2], %s475_s2  ;;  %s664_s16 = smov 96  }
  0xa5   : > { %s665_s17 = smov 64   ;;  %s666_s18 = smov 8  }
  0xa6   : > { %s667_s19 = smov 24   ;;  %s668_s20 = smov 16  }
  0xa7   : > { %v130_v10 = vld [vmem:[%s129_s12] sm:$0xf]  ;;  %s383_s21 = scalar_lea.vmem [#allocation3], %s475_s2  ;;  %s124_s9 = sadd.s32 1, %s654_s9  }
  0xa8   : > { %134 = vrot.lane.b32.xlu0 %v130_v10, %s661_s13  ;;  %132 = vrot.lane.b32.xlu1 %v130_v10, %s662_s14  ;;  %v138_v11 = vunpack.c.l.b16 %v130_v10  ;;  %p121_p0 = scmp.ge.s32.totalorder %s124_s9, 2  }
  0xa9   :  { %s669_s24 = smov (%p121_p0), [#allocation10]   ;;  %s438_s28 = sshll.u32 (%p121_p0), %s778_s5, 4  ;;  %s439_s28 = int_to_ptr.hbm [resolvable:$true] %s438_s28 }
  0xaa   : > { %v726_v12 = vpack.c.b16 %v138_v11, %v138_v11  ;;  %s436_s25 = sshll.u32 (%p121_p0), %s669_s24, 4  ;;  %s670_s29 = smov (%p121_p0), 128   ;;  %s437_s25 = int_to_ptr.vmem [resolvable:$true] %s436_s25 }
  0xab   :  { %s671_s30 = smov (%p121_p0), 8  }
  0xb0   : > { %136 = vrot.lane.b32.xlu0 %v130_v10, %s663_s15 }
  0xb8   : > { %140 = vrot.lane.b32.xlu0 %v726_v12, %s664_s16 }
 0x11a   : > { %v135_v13 = vpop.permute.xlu0 %134  ;;  %v133_v18 = vpop.permute.xlu1 %132 }
 0x11b   : > { %v185_v14 = vunpack.c.l.b16 %v135_v13  ;;  %v162_v20 = vunpack.c.l.b16 %v133_v18 }
 0x11d   : > { %v729_v15 = vpack.c.b16 %v185_v14, %v185_v14  ;;  %v163_v21 = vpack.c.b16 %v162_v20, %v162_v20 }
 0x11f   : > { %187 = vrot.lane.b32.xlu1 %v729_v15, %s664_s16 }
 0x122   : > { %v137_v16 = vpop.permute.xlu0 %136 }
 0x123   : > { %v208_v17 = vunpack.c.l.b16 %v137_v16 }
 0x125   : > { %v209_v19 = vpack.c.b16 %v208_v17, %v208_v17 }
 0x127   : > { %210 = vrot.lane.b32.xlu2 %v209_v19, %s664_s16 }
 0x12a   : > { %v141_v24 = vpop.permute.xlu0 %140 }
 0x12b   : > { %v147_v25 = vsel %vm142_vm2, %v141_v24, 0 }
 0x12c   : > { %156 = vmatpush.bf16.xpose.msra.mxu0 %v147_v25 }
 0x12f   : > { %164 = vrot.lane.b32.xlu2 %v163_v21, %s664_s16 }
 0x133   : > { %476 = vmatmul.msk.bf16.vlgmr.msra.gmra.mxu0 %vm142_vm2, %v130_v10 }
 0x181   : > { %v211_v22 = vpop.permute.xlu2 %210 }
 0x182   : > { %v216_v23 = vsel %vm142_vm2, %v211_v22, 0 }
 0x183   : > { %225 = vmatpush.bf16.xpose.msra.mxu3 %v216_v23 }
 0x189   : > { %v165_v26 = vpop.permute.xlu2 %164 }
 0x18a   : > { %479 = vmatmul.msk.bf16.vlgmr.msra.gmra.mxu3 %vm142_vm2, %v137_v16  ;;  %v170_v27 = vsel %vm142_vm2, %v165_v26, 0 }
 0x18b   : > { %179 = vmatpush.bf16.xpose.msra.mxu1 %v170_v27 }
 0x191   : > { %v188_v28 = vpop.permute.xlu1 %187 }
 0x192   : > { %477 = vmatmul.msk.bf16.vlgmr.msra.gmra.mxu1 %vm142_vm2, %v133_v18  ;;  %v193_v29 = vsel %vm142_vm2, %v188_v28, 0 }
 0x193   : > { %202 = vmatpush.bf16.xpose.msra.mxu2 %v193_v29 }
 0x19a   : > { %478 = vmatmul.msk.bf16.vlgmr.msra.gmra.mxu2 %vm142_vm2, %v135_v13 }
 0x1b0   : > { %v158_v30 = vpop.f32.mrf.mxu0 }
 0x1b1   : > { %v231_v36 = vsel %vm142_vm2, %v158_v30, -inf }
 0x1b8   : > { %v160_v35 = vpop.f32.mrf.mxu0 }
 0x20d   : > { %v227_v31 = vpop.f32.mrf.mxu3 }
 0x20e   : > { %v240_v32 = vsel %vm142_vm2, %v227_v31, -inf }
 0x20f   : > { %241 = vmax.xlane.f32.xlu2 %v240_v32  ;;  %v181_v33 = vpop.f32.mrf.mxu1 }
 0x210   : > { %v234_v34 = vsel %vm142_vm2, %v181_v33, -inf }
 0x211   : > { %235 = vmax.xlane.f32.xlu0 %v234_v34 }
 0x215   : > { %v229_v37 = vpop.f32.mrf.mxu3 }
 0x216   :  { %v503_v37 = vld [vmem:[#allocation9 + $0x8] sm:$0xff] (%p121_p0) }
 0x217   : > { %v183_v38 = vpop.f32.mrf.mxu1  ;;  %232 = vmax.xlane.f32.xlu2 %v231_v36 }
 0x218   :  { %v502_v38 = vld [vmem:[#allocation9] sm:$0xff] (%p121_p0) }
 0x21d   : > { %v204_v39 = vpop.f32.mrf.mxu2 }
 0x21e   : > { %v237_v40 = vsel %vm142_vm2, %v204_v39, -inf }
 0x21f   : > { %238 = vmax.xlane.f32.xlu1 %v237_v40  ;;  %v545_v40 = vld [vmem:[%s777_s4] ss:$0 sm:$0xff] (%p121_p0) }
 0x225   : > { %v206_v41 = vpop.f32.mrf.mxu2 }
 0x282   : > { %v242_v42 = vpop.xlane.xlu2 %241 }
 0x283   : > { %v246_v43 = vsub.f32 %v227_v31, %v242_v42 }
 0x284   : > { %v236_v44 = vpop.xlane.xlu0 %235 }
 0x285   : > { %v253_v45 = vmul.f32 1.442695, %v246_v43  ;;  %v244_v46 = vsub.f32 %v181_v33, %v236_v44 }
 0x287   : > { %529 = vpow2.f32 %v253_v45  ;;  %v249_v47 = vmul.f32 1.442695, %v244_v46 }
 0x289   : > { %531 = vpow2.f32 %v249_v47 }
 0x28a   : > { %v233_v57 = vpop.xlane.xlu2 %232 }
 0x28b   : > { %v243_v58 = vsub.f32 %v158_v30, %v233_v57 }
 0x28d   : > { %v530_v48 = vpop.eup %529  ;;  %v247_v59 = vmul.f32 1.442695, %v243_v58 }
 0x28e   : > { %v264_v49 = vsel %vm142_vm2, %v530_v48, 0.0 }
 0x28f   : > { %v532_v50 = vpop.eup %531  ;;  %265 = vadd.xlane.f32.xlu2 %v264_v49 }
 0x290   : > { %v258_v51 = vsel %vm142_vm2, %v532_v50, 0.0 }
 0x291   : > { %259 = vadd.xlane.f32.xlu0 %v258_v51 }
 0x292   : > { %v239_v52 = vpop.xlane.xlu1 %238 }
 0x293   : > { %v245_v53 = vsub.f32 %v204_v39, %v239_v52 }
 0x295   : > { %v251_v54 = vmul.f32 1.442695, %v245_v53 }
 0x297   : > { %533 = vpow2.f32 %v251_v54 }
 0x298   : > { %535 = vpow2.f32 %v247_v59 }
 0x29d   : > { %v534_v55 = vpop.eup %533 }
 0x29e   : > { %v261_v56 = vsel %vm142_vm2, %v534_v55, 0.0  ;;  %v536_v60 = vpop.eup %535 }
 0x29f   : > { %262 = vadd.xlane.f32.xlu1 %v261_v56  ;;  %v255_v61 = vsel %vm142_vm2, %v536_v60, 0.0 }
 0x2a5   : > { %301 = vrot.lane.b32.xlu0 %v163_v21, %s665_s17 }
 0x2a7   : > { %343 = vrot.lane.b32.xlu2 %v209_v19, %s665_s17 }
 0x2ad   : > { %279 = vrot.lane.b32.xlu0 %v726_v12, %s665_s17 }
 0x2b8   : > { %322 = vrot.lane.b32.xlu1 %v729_v15, %s665_s17 }
 0x2e2   : > { %256 = vadd.xlane.f32.xlu1 %v255_v61 }
 0x302   : > { %v266_v62 = vpop.xlane.xlu2 %265 }
 0x303   : > { %537 = vrcp.f32 %v266_v62 }
 0x304   : > { %v260_v1 = vpop.xlane.xlu0 %259 }
 0x305   : > { %539 = vrcp.f32 %v260_v1 }
 0x309   : > { %v538_v63 = vpop.eup %537 }
 0x30a   : > { %v274_v0 = vmul.f32 %v538_v63, %v530_v48  ;;  %v344_v2 = vpop.permute.xlu2 %343 }
 0x30b   : > { %v349_v3 = vsel %vm284_vm3, %v344_v2, 0  ;;  %v540_v5 = vpop.eup %539 }
 0x30c   : > { %358 = vmatpush.bf16.msrb.mxu3 %v349_v3  ;;  %v278_v4 = vpack.c.bf16 %v274_v0, %v274_v0  ;;  %v272_v6 = vmul.f32 %v540_v5, %v532_v50 }
 0x30e   : > { %v276_v9 = vpack.c.bf16 %v272_v6, %v272_v6 }
 0x30f   : > { %483 = vmatmul.msk.bf16.vlgmr.msrb.gmra.mxu3 %vm142_vm2, %v278_v4 }
 0x312   : > { %v263_v10 = vpop.xlane.xlu1 %262 }
 0x313   : > { %541 = vrcp.f32 %v263_v10 }
 0x317   : > { %v302_v7 = vpop.permute.xlu0 %301 }
 0x318   : > { %v307_v8 = vsel %vm284_vm3, %v302_v7, 0 }
 0x319   : > { %316 = vmatpush.bf16.msrb.mxu1 %v307_v8  ;;  %v542_v11 = vpop.eup %541 }
 0x31a   : > { %v273_v12 = vmul.f32 %v542_v11, %v534_v55 }
 0x31c   : > { %481 = vmatmul.msk.bf16.vlgmr.msrb.gmra.mxu1 %vm142_vm2, %v276_v9  ;;  %v277_v15 = vpack.c.bf16 %v273_v12, %v273_v12 }
 0x31f   : > { %v280_v16 = vpop.permute.xlu0 %279 }
 0x320   : > { %v286_v17 = vsel %vm284_vm3, %v280_v16, 0 }
 0x321   : > { %295 = vmatpush.bf16.msrb.mxu0 %v286_v17 }
 0x325   :  { %422 = vmatpush.bf16.msra.mxu0 (%p121_p0), %v503_v37 }
 0x329   :  { %423 = vmatpush.bf16.msra.mxu0 (%p121_p0), %v502_v38 }
 0x32a   : > { %v323_v13 = vpop.permute.xlu1 %322 }
 0x32b   : > { %v328_v14 = vsel %vm284_vm3, %v323_v13, 0 }
 0x32c   : > { %337 = vmatpush.bf16.msrb.mxu2 %v328_v14 }
 0x32f   : > { %482 = vmatmul.msk.bf16.vlgmr.msrb.gmra.mxu2 %vm142_vm2, %v277_v15 }
 0x355   : > { %v257_v18 = vpop.xlane.xlu1 %256 }
 0x356   : > { %543 = vrcp.f32 %v257_v18 }
 0x35c   : > { %v544_v19 = vpop.eup %543 }
 0x35d   : > { %v271_v20 = vmul.f32 %v544_v19, %v536_v60 }
 0x35f   : > { %v275_v21 = vpack.c.bf16 %v271_v20, %v271_v20 }
 0x361   : > { %480 = vmatmul.msk.bf16.vlgmr.msrb.gmra.mxu0 %vm142_vm2, %v275_v21 }
 0x392   : > { %v360_v22 = vpop.f32.mrf.mxu3 }
 0x399   : > { %v318_v23 = vpop.f32.mrf.mxu1 }
 0x39a   : > { %v362_v24 = vpop.f32.mrf.mxu3  ;;  %365 = vrot.lane.b32.xlu2 %v318_v23, %s666_s18 }
 0x3a1   : > { %v320_v25 = vpop.f32.mrf.mxu1 }
 0x3a2   : > { %373 = vrot.lane.b32.xlu2 %v360_v22, %s667_s19 }
 0x3b2   : > { %v339_v26 = vpop.f32.mrf.mxu2 }
 0x3b3   : > { %369 = vrot.lane.b32.xlu0 %v339_v26, %s668_s20 }
 0x3ba   : > { %v341_v27 = vpop.f32.mrf.mxu2 }
 0x3de   : > { %v297_v28 = vpop.f32.mrf.mxu0 }
 0x3e6   : > { %v299_v29 = vpop.f32.mrf.mxu0 }
 0x3f4   : > { %v366_v30 = vpop.permute.xlu2 %365 }
 0x3f5   : > { %v376_v31 = vsel %vm142_vm2, %v297_v28, %v366_v30 }
 0x3fc   : > { %v374_v33 = vpop.permute.xlu2 %373 }
 0x425   : > { %v370_v32 = vpop.permute.xlu0 %369 }
 0x426   : > { %v378_v34 = vsel %vm377_vm4, %v376_v31, %v370_v32  ;;  %123 = sbr.rel (!%p121_p0) target bundleno = 161 (0xa1), region = 61 }
 0x427   : > { %v380_v35 = vsel %vm379_vm5, %v378_v34, %v374_v33 }
 0x428   : > { %v381_v36 = vpack.c.bf16 %v380_v35, %v380_v35 }
 0x42a   : > { %385 = vst.msk [vmem:[%s383_s21] sm:$0xf] %vm384_vm6, %v381_v36 }
 0x431   :  { %v501_v39 = vld [vmem:[#allocation3] sm:$0xff] }
 0x432   :  { %497 = vmatmul.msk.bf16.vlgmr.msra.gmra.mxu0 %vm96_vm0, %v501_v39 }
 0x4af   :  { %v425_v41 = vpop.f32.mrf.mxu0 }
 0x4b0   :  { %v426_v42 = vadd.f32 %v545_v40, %v425_v41 }
 0x4b2   :  { %430 = vst.msk [vmem:[#allocation10] sm:$0xff] %vm96_vm0, %v426_v42 }
 0x4b7   :  { %v427_v43 = vpop.f32.mrf.mxu0 }
 0x4b8   :  { %v428_v44 = vadd.f32 %v545_v40, %v427_v43 }
 0x4ba   :  { %431 = vst.msk [vmem:[#allocation10 + $0x8] sm:$0xff] %vm96_vm0, %v428_v44 }
 0x4bb   :  { %444 = dma.vmem_to_hbm [thread:$0]  %s437_s25, 256, %s439_s28, [#allocation6], %s670_s29, %s670_s29, %s671_s30  }
 0x4bc   :  { %650 = dma.done.wait [#allocation6], 256  }
 0x4bd   :  { %651 = vsyncadd [#allocation6], 4294967040 }
 0x4be   :  { %449 = vsyncpa [#allocation5], 1 }
 0x4bf   :  { %450 = vsyncpa [#allocation8], 1 }
 0x4c0   :  { %451 = vsyncpa [#allocation6], 1 }

</bundles_post_ra>
